<compile_context>
chip_gen: v5e
topology: v5e:2x2
jax: 0.10.0
libtpu: 0.0.40
codegen_flags: <defaults>
</compile_context>

<pallas_src>
import jax
import jax.numpy as jnp
from jax.experimental import pallas as pl
from jax.experimental.pallas import tpu as pltpu


# --------------------------------------------------------------------------- #
# Kernel
# --------------------------------------------------------------------------- #
def _make_coupling_kernel(n_layers, half, reverse, compute_dtype, fused):
    """Kernel closed over static #layers, half-dim, mode, dtype and fusion mode."""

    def kernel(*refs):
        # ref order (forward): x1, x2, ldj, weights..., y2_out, ldj_out
        # ref order (reverse): x1, x2,      weights..., y2_out
        idx = 0
        x1_ref = refs[idx]; idx += 1
        x2_ref = refs[idx]; idx += 1
        if not reverse:
            ldj_ref = refs[idx]; idx += 1
        n_w = (2 if fused else 4) * n_layers
        w_refs = refs[idx: idx + n_w]; idx += n_w
        y2_ref = refs[idx]; idx += 1
        if not reverse:
            ldj_out_ref = refs[idx]

        x1 = x1_ref[...].astype(jnp.float32)
        x2 = x2_ref[...].astype(jnp.float32)

        def mlp(h0, params):
            """Matmul chain with ReLU hidden / Tanh output (f32 accumulate)."""
            h = h0.astype(compute_dtype)
            for l in range(n_layers):
                w = params[2 * l][...]                 # (in, out), compute_dtype
                b = params[2 * l + 1][...]             # (1, out), f32 -> broadcasts
                h = jnp.dot(h, w, preferred_element_type=jnp.float32) + b
                if l < n_layers - 1:
                    h = jnp.maximum(h, 0.0)            # ReLU (f32 VPU)
                    h = h.astype(compute_dtype)
                else:
                    h = jnp.tanh(h)                    # Tanh (f32 EUP)
            return h

        if fused:
            # Columns [:half] follow the scale net, [half:] the shift net
            # (block-diagonal weights keep them independent).
            h = mlp(x1, w_refs)
            log_s = h[:, :half]                        # pre-exp scale = log(scale)
            shift = h[:, half:]
        else:
            log_s = mlp(x1, w_refs[:2 * n_layers])
            shift = mlp(x1, w_refs[2 * n_layers:])

        if reverse:
            inv_scale = jnp.exp(-log_s)                # exact, no divide
            y2_ref[...] = ((x2 - shift) * inv_scale).astype(y2_ref.dtype)
        else:
            scale = jnp.exp(log_s)
            y2_ref[...] = (x2 * scale + shift).astype(y2_ref.dtype)
            # log(scale).sum(dim=1) == log_s.sum(dim=1); lane-axis XLU reduce.
            ldj_out_ref[...] = ldj_ref[...] + jnp.sum(log_s, axis=1, keepdims=True)

    return kernel


# --------------------------------------------------------------------------- #
# Parameter packing
# --------------------------------------------------------------------------- #
def _fuse_params(scale_params, shift_params, n_layers, compute_dtype):
    """Pack scale || shift networks into one matmul chain (block-diagonal)."""
    fused = []
    for l in range(n_layers):
        ws, bs = scale_params[2 * l], scale_params[2 * l + 1]
        wt, bt = shift_params[2 * l], shift_params[2 * l + 1]
        if l == 0:
            # Both nets read the same x1: horizontal concat.
            w = jnp.concatenate([ws, wt], axis=1)
        else:
            # Independent hidden states: block-diagonal.
            z_tr = jnp.zeros((ws.shape[0], wt.shape[1]), ws.dtype)
            z_bl = jnp.zeros((wt.shape[0], ws.shape[1]), wt.dtype)
            w = jnp.concatenate(
                [jnp.concatenate([ws, z_tr], axis=1),
                 jnp.concatenate([z_bl, wt], axis=1)], axis=0)
        b = jnp.concatenate([bs, bt], axis=1)
        fused += [w.astype(compute_dtype), b.astype(jnp.float32)]
    return fused


def _cast_params(params, compute_dtype):
    out = []
    for i, p in enumerate(params):
        out.append(p.astype(compute_dtype if i % 2 == 0 else jnp.float32))
    return out


def _choose_batch_tile(B, half, budget_bytes=8 << 20):
    """Largest multiple-of-8 tile dividing B whose double-buffered activations
    stay well under the VMEM budget (safe for v7x's 32 MiB scoped default)."""
    per_row = (4 * half + 2) * 4 * 2        # x1,x2,y2 + ldj in/out, f32, 2 buffers
    cap = max(8, budget_bytes // max(per_row, 1))
    if B % 8 != 0:
        return B                            # block must equal full dim if not /8
    tb = min(B, (cap // 8) * 8)
    while tb > 8 and B % tb != 0:
        tb -= 8
    return tb if B % tb == 0 else B


# --------------------------------------------------------------------------- #
# Wrapper
# --------------------------------------------------------------------------- #
def affine_coupling_forward(x, log_det_J, scale_params, shift_params,
                            mask_config, hidden, reverse=False,
                            tb=None, use_bf16=False, fuse=None):
    """Pallas-backed equivalent of AffineCoupling.forward.

    x:          [B, in_out_dim] float32
    log_det_J:  [B]             float32
    scale_params / shift_params: flat lists [W0, b0, ..., Wout, bout],
      W_l: [in, out], b_l: [1, out]  (nn.Linear weights stored input-major).
    """
    B, D = x.shape
    half = D // 2
    n_layers = hidden + 1
    compute_dtype = jnp.bfloat16 if use_bf16 else jnp.float32

    # Fuse the two nets into one chain only when the fused width still fits a
    # single 128-lane MXU tile; past that, block-diagonal doubles the FLOPs.
    if fuse is None:
        max_width = max(scale_params[2 * l].shape[1] for l in range(n_layers))
        fuse = (2 * max_width) <= 128

    x1 = x[:, mask_config::2]               # [B, half] untransformed half
    x2 = x[:, 1 - mask_config::2]           # [B, half] transformed half

    if fuse:
        params = _fuse_params(scale_params, shift_params, n_layers, compute_dtype)
    else:
        params = (_cast_params(scale_params, compute_dtype)
                  + _cast_params(shift_params, compute_dtype))

    if tb is None:
        tb = _choose_batch_tile(B, half)
    if B % tb != 0:
        tb = B
    grid = (B // tb,)

    kernel = _make_coupling_kernel(n_layers, half, reverse, compute_dtype, fuse)

    batch_spec = pl.BlockSpec((tb, half), lambda i: (i, 0))
    in_specs = [batch_spec, batch_spec]
    inputs = [x1, x2]
    if not reverse:
        in_specs.append(pl.BlockSpec((tb, 1), lambda i: (i, 0)))
        inputs.append(log_det_J.reshape(B, 1).astype(jnp.float32))
    # Weights: full-array blocks, constant index_map -> VMEM-resident across steps.
    in_specs += [pl.BlockSpec(p.shape, lambda i: (0, 0)) for p in params]
    inputs += params

    if reverse:
        out_shape = jax.ShapeDtypeStruct((B, half), x.dtype)
        out_specs = batch_spec
    else:
        out_shape = (jax.ShapeDtypeStruct((B, half), x.dtype),
                     jax.ShapeDtypeStruct((B, 1), jnp.float32))
        out_specs = (batch_spec, pl.BlockSpec((tb, 1), lambda i: (i, 0)))

    result = pl.pallas_call(
        kernel,
        out_shape=out_shape,
        grid=grid,
        in_specs=in_specs,
        out_specs=out_specs,
        compiler_params=pltpu.CompilerParams(
            dimension_semantics=("parallel",)),     # 2 TCs on v7x split the batch
    )(*inputs)

    if reverse:
        y2 = result
        ldj_out = log_det_J                          # pure passthrough, no kernel trip
    else:
        y2, ldj2d = result
        ldj_out = ldj2d.reshape(B)

    y1 = x1
    pair = [y1, y2] if mask_config == 0 else [y2, y1]
    # torch.stack(..., dim=2).view(-1, in_out_dim) == interleave columns
    y = jnp.stack(pair, axis=2).reshape(B, D)
    return y, ldj_out


# --------------------------------------------------------------------------- #
# Pure-JAX reference (mirrors the PyTorch module)
# --------------------------------------------------------------------------- #
def _ref_forward(x, log_det_J, scale_params, shift_params, mask_config, reverse=False):
    x1 = x[:, mask_config::2]
    x2 = x[:, 1 - mask_config::2]

    def mlp(h, params):
        n = len(params) // 2
        for l in range(n):
            h = h @ params[2 * l] + params[2 * l + 1]
            h = jnp.maximum(h, 0.0) if l < n - 1 else jnp.tanh(h)
        return h

    log_s = mlp(x1, scale_params)
    shift = mlp(x1, shift_params)
    scale = jnp.exp(log_s)
    if reverse:
        y2 = (x2 - shift) / scale
        ldj = log_det_J
    else:
        y2 = x2 * scale + shift
        ldj = log_det_J + jnp.sum(log_s, axis=1)
    pair = [x1, y2] if mask_config == 0 else [y2, x1]
    y = jnp.stack(pair, axis=2).reshape(x.shape)
    return y, ldj


def _init_mlp_params(key, in_dim, mid_dim, out_dim, hidden):
    params = []
    dims = [in_dim] + [mid_dim] * hidden + [out_dim]
    for l in range(hidden + 1):
        key, kw, kb = jax.random.split(key, 3)
        bound = 1.0 / jnp.sqrt(dims[l])
        w = jax.random.uniform(kw, (dims[l], dims[l + 1]), jnp.float32, -bound, bound)
        b = jax.random.uniform(kb, (1, dims[l + 1]), jnp.float32, -bound, bound)
        params += [w, b]
    return params, key


def _check_config(key, in_out_dim, mid_dim, hidden, batch, tb):
    key, kx, kj = jax.random.split(key, 3)
    x = jax.random.normal(kx, (batch, in_out_dim), jnp.float32)
    log_det_J = jax.random.normal(kj, (batch,), jnp.float32)

    scale_params, key = _init_mlp_params(key, in_out_dim // 2, mid_dim,
                                         in_out_dim // 2, hidden)
    shift_params, key = _init_mlp_params(key, in_out_dim // 2, mid_dim,
                                         in_out_dim // 2, hidden)

    for mask_config in (0, 1):
        # Forward (sampling mode)
        y, ldj = affine_coupling_forward(x, log_det_J, scale_params, shift_params,
                                         mask_config, hidden, reverse=False, tb=tb)
        y = jax.block_until_ready(y)
        ldj = jax.block_until_ready(ldj)

        y_ref, ldj_ref = _ref_forward(x, log_det_J, scale_params, shift_params,
                                      mask_config, reverse=False)
        assert jnp.allclose(y, y_ref, atol=1e-5, rtol=1e-5), "y mismatch"
        assert jnp.allclose(ldj, ldj_ref, atol=1e-5, rtol=1e-5), "log_det_J mismatch"

        # Reverse (inference mode) round-trip: reverse(forward(x)) == x
        x_rec, ldj_rec = affine_coupling_forward(y, ldj, scale_params, shift_params,
                                                 mask_config, hidden, reverse=True,
                                                 tb=tb)
        x_rec = jax.block_until_ready(x_rec)
        assert jnp.allclose(x_rec, x, atol=1e-4, rtol=1e-4), "reverse round-trip mismatch"
        assert jnp.allclose(ldj_rec, ldj, atol=1e-6), "reverse ldj passthrough mismatch"
    return key


if __name__ == "__main__":
    key = jax.random.PRNGKey(0)

    # Config A: 2*mid = 64 <= 128 -> fused single-chain path; batch tiled as
    # 2 grid steps of tb=8 to exercise the double-buffered pipeline.
    key = _check_config(key, in_out_dim=16, mid_dim=32, hidden=2, batch=16, tb=8)

    # Config B: 2*mid = 512 > 128 -> auto-selects the separate-chain path
    # (still one kernel pass over x1, fused epilogue).
    key = _check_config(key, in_out_dim=16, mid_dim=256, hidden=1, batch=16, tb=8)

    print("KERNEL_OK")
</pallas_src>

<mosaic_0001>
module attributes {stable_mosaic.version = 11 : i64} {
  func.func @kernel(%arg0: i32, %arg1: memref<8x8xf32, #tpu.memory_space<vmem>>, %arg2: memref<8x8xf32, #tpu.memory_space<vmem>>, %arg3: memref<8x1xf32, #tpu.memory_space<vmem>>, %arg4: memref<8x64xf32, #tpu.memory_space<vmem>>, %arg5: memref<1x64xf32, #tpu.memory_space<vmem>>, %arg6: memref<64x64xf32, #tpu.memory_space<vmem>>, %arg7: memref<1x64xf32, #tpu.memory_space<vmem>>, %arg8: memref<64x16xf32, #tpu.memory_space<vmem>>, %arg9: memref<1x16xf32, #tpu.memory_space<vmem>>, %arg10: memref<8x8xf32, #tpu.memory_space<vmem>>, %arg11: memref<8x1xf32, #tpu.memory_space<vmem>>) attributes {dimension_semantics = [#tpu.dimension_semantics<parallel>], iteration_bounds = array<i64: 2>, scalar_prefetch = 0 : i64, scratch_operands = 0 : i64, tpu.core_type = #tpu.core_type<tc>, window_params = [{transform_indices = @transform_0, window_bounds = array<i64: 8, 8>}, {transform_indices = @transform_1, window_bounds = array<i64: 8, 8>}, {transform_indices = @transform_2, window_bounds = array<i64: 8, 1>}, {pipeline_mode = #tpu.pipeline_mode<synchronous>, transform_indices = @transform_3, window_bounds = array<i64: 8, 64>}, {pipeline_mode = #tpu.pipeline_mode<synchronous>, transform_indices = @transform_4, window_bounds = array<i64: 1, 64>}, {pipeline_mode = #tpu.pipeline_mode<synchronous>, transform_indices = @transform_5, window_bounds = array<i64: 64, 64>}, {pipeline_mode = #tpu.pipeline_mode<synchronous>, transform_indices = @transform_6, window_bounds = array<i64: 1, 64>}, {pipeline_mode = #tpu.pipeline_mode<synchronous>, transform_indices = @transform_7, window_bounds = array<i64: 64, 16>}, {pipeline_mode = #tpu.pipeline_mode<synchronous>, transform_indices = @transform_8, window_bounds = array<i64: 1, 16>}, {transform_indices = @transform_9, window_bounds = array<i64: 8, 8>}, {transform_indices = @transform_10, window_bounds = array<i64: 8, 1>}]} {
    %c0 = arith.constant 0 : index
    %c0_0 = arith.constant 0 : index
    %0 = vector.load %arg1[%c0, %c0_0] : memref<8x8xf32, #tpu.memory_space<vmem>>, vector<8x8xf32>
    %c0_1 = arith.constant 0 : index
    %c0_2 = arith.constant 0 : index
    %1 = vector.load %arg2[%c0_1, %c0_2] : memref<8x8xf32, #tpu.memory_space<vmem>>, vector<8x8xf32>
    %c0_3 = arith.constant 0 : index
    %c0_4 = arith.constant 0 : index
    %2 = vector.load %arg4[%c0_3, %c0_4] : memref<8x64xf32, #tpu.memory_space<vmem>>, vector<8x64xf32>
    %c0_5 = arith.constant 0 : index
    %c0_6 = arith.constant 0 : index
    %3 = vector.load %arg5[%c0_5, %c0_6] : memref<1x64xf32, #tpu.memory_space<vmem>>, vector<1x64xf32>
    %cst = arith.constant dense<0.000000e+00> : vector<8x64xf32>
    %4 = tpu.matmul %0, %2, %cst {dimension_numbers = #tpu.dot_dimension_numbers<[1], [0], [0], [1], [0, 0, 1, 1], [], []>} : vector<8x8xf32>, vector<8x64xf32>, vector<8x64xf32> -> vector<8x64xf32>
    %5 = vector.broadcast %3 : vector<1x64xf32> to vector<8x64xf32>
    %6 = arith.addf %4, %5 : vector<8x64xf32>
    %cst_7 = arith.constant 0.000000e+00 : f32
    %7 = vector.broadcast %cst_7 : f32 to vector<8x64xf32>
    %8 = arith.maximumf %6, %7 : vector<8x64xf32>
    %c0_8 = arith.constant 0 : index
    %c0_9 = arith.constant 0 : index
    %9 = vector.load %arg6[%c0_8, %c0_9] : memref<64x64xf32, #tpu.memory_space<vmem>>, vector<64x64xf32>
    %c0_10 = arith.constant 0 : index
    %c0_11 = arith.constant 0 : index
    %10 = vector.load %arg7[%c0_10, %c0_11] : memref<1x64xf32, #tpu.memory_space<vmem>>, vector<1x64xf32>
    %cst_12 = arith.constant dense<0.000000e+00> : vector<8x64xf32>
    %11 = tpu.matmul %8, %9, %cst_12 {dimension_numbers = #tpu.dot_dimension_numbers<[1], [0], [0], [1], [0, 0, 1, 1], [], []>} : vector<8x64xf32>, vector<64x64xf32>, vector<8x64xf32> -> vector<8x64xf32>
    %12 = vector.broadcast %10 : vector<1x64xf32> to vector<8x64xf32>
    %13 = arith.addf %11, %12 : vector<8x64xf32>
    %cst_13 = arith.constant 0.000000e+00 : f32
    %14 = vector.broadcast %cst_13 : f32 to vector<8x64xf32>
    %15 = arith.maximumf %13, %14 : vector<8x64xf32>
    %c0_14 = arith.constant 0 : index
    %c0_15 = arith.constant 0 : index
    %16 = vector.load %arg8[%c0_14, %c0_15] : memref<64x16xf32, #tpu.memory_space<vmem>>, vector<64x16xf32>
    %c0_16 = arith.constant 0 : index
    %c0_17 = arith.constant 0 : index
    %17 = vector.load %arg9[%c0_16, %c0_17] : memref<1x16xf32, #tpu.memory_space<vmem>>, vector<1x16xf32>
    %cst_18 = arith.constant dense<0.000000e+00> : vector<8x16xf32>
    %18 = tpu.matmul %15, %16, %cst_18 {dimension_numbers = #tpu.dot_dimension_numbers<[1], [0], [0], [1], [0, 0, 1, 1], [], []>} : vector<8x64xf32>, vector<64x16xf32>, vector<8x16xf32> -> vector<8x16xf32>
    %19 = vector.broadcast %17 : vector<1x16xf32> to vector<8x16xf32>
    %20 = arith.addf %18, %19 : vector<8x16xf32>
    %21 = math.tanh %20 : vector<8x16xf32>
    %22 = vector.extract_strided_slice %21 {offsets = [0, 0], sizes = [8, 8], strides = [1, 1]} : vector<8x16xf32> to vector<8x8xf32>
    %23 = vector.extract_strided_slice %21 {offsets = [0, 8], sizes = [8, 8], strides = [1, 1]} : vector<8x16xf32> to vector<8x8xf32>
    %24 = math.exp %22 : vector<8x8xf32>
    %25 = arith.mulf %1, %24 : vector<8x8xf32>
    %26 = arith.addf %25, %23 : vector<8x8xf32>
    %c0_19 = arith.constant 0 : index
    %c0_20 = arith.constant 0 : index
    %27 = vector.load %arg10[%c0_19, %c0_20] : memref<8x8xf32, #tpu.memory_space<vmem>>, vector<8x8xf32>
    tpu.vector_store %arg10[%c0_19, %c0_20], %26 {strides = array<i32>} : memref<8x8xf32, #tpu.memory_space<vmem>>, vector<8x8xf32>,
    %c0_21 = arith.constant 0 : index
    %c0_22 = arith.constant 0 : index
    %28 = vector.load %arg3[%c0_21, %c0_22] : memref<8x1xf32, #tpu.memory_space<vmem>>, vector<8x1xf32>
    %cst_23 = arith.constant dense<0.000000e+00> : vector<8xf32>
    %29 = vector.multi_reduction <add>, %22, %cst_23 [1] : vector<8x8xf32> to vector<8xf32>
    %30 = vector.shape_cast %29 : vector<8xf32> to vector<8x1xf32>
    %31 = arith.addf %28, %30 : vector<8x1xf32>
    %c0_24 = arith.constant 0 : index
    %c0_25 = arith.constant 0 : index
    %32 = vector.load %arg11[%c0_24, %c0_25] : memref<8x1xf32, #tpu.memory_space<vmem>>, vector<8x1xf32>
    tpu.vector_store %arg11[%c0_24, %c0_25], %31 {strides = array<i32>} : memref<8x1xf32, #tpu.memory_space<vmem>>, vector<8x1xf32>,
    return
  }
  func.func @transform_0(%arg0: i32) -> (i32, i32) {
    %c0_i32 = arith.constant 0 : i32
    %c0_i32_0 = arith.constant 0 : i32
    return %arg0, %c0_i32 : i32, i32
  }
  func.func @transform_1(%arg0: i32) -> (i32, i32) {
    %c0_i32 = arith.constant 0 : i32
    %c0_i32_0 = arith.constant 0 : i32
    return %arg0, %c0_i32 : i32, i32
  }
  func.func @transform_2(%arg0: i32) -> (i32, i32) {
    %c0_i32 = arith.constant 0 : i32
    %c0_i32_0 = arith.constant 0 : i32
    return %arg0, %c0_i32 : i32, i32
  }
  func.func @transform_3(%arg0: i32) -> (i32, i32) {
    %c0_i32 = arith.constant 0 : i32
    %c0_i32_0 = arith.constant 0 : i32
    %c0_i32_1 = arith.constant 0 : i32
    return %c0_i32, %c0_i32_0 : i32, i32
  }
  func.func @transform_4(%arg0: i32) -> (i32, i32) {
    %c0_i32 = arith.constant 0 : i32
    %c0_i32_0 = arith.constant 0 : i32
    %c0_i32_1 = arith.constant 0 : i32
    return %c0_i32, %c0_i32_0 : i32, i32
  }
  func.func @transform_5(%arg0: i32) -> (i32, i32) {
    %c0_i32 = arith.constant 0 : i32
    %c0_i32_0 = arith.constant 0 : i32
    %c0_i32_1 = arith.constant 0 : i32
    return %c0_i32, %c0_i32_0 : i32, i32
  }
  func.func @transform_6(%arg0: i32) -> (i32, i32) {
    %c0_i32 = arith.constant 0 : i32
    %c0_i32_0 = arith.constant 0 : i32
    %c0_i32_1 = arith.constant 0 : i32
    return %c0_i32, %c0_i32_0 : i32, i32
  }
  func.func @transform_7(%arg0: i32) -> (i32, i32) {
    %c0_i32 = arith.constant 0 : i32
    %c0_i32_0 = arith.constant 0 : i32
    %c0_i32_1 = arith.constant 0 : i32
    return %c0_i32, %c0_i32_0 : i32, i32
  }
  func.func @transform_8(%arg0: i32) -> (i32, i32) {
    %c0_i32 = arith.constant 0 : i32
    %c0_i32_0 = arith.constant 0 : i32
    %c0_i32_1 = arith.constant 0 : i32
    return %c0_i32, %c0_i32_0 : i32, i32
  }
  func.func @transform_9(%arg0: i32) -> (i32, i32) {
    %c0_i32 = arith.constant 0 : i32
    %c0_i32_0 = arith.constant 0 : i32
    return %arg0, %c0_i32 : i32, i32
  }
  func.func @transform_10(%arg0: i32) -> (i32, i32) {
    %c0_i32 = arith.constant 0 : i32
    %c0_i32_0 = arith.constant 0 : i32
    return %arg0, %c0_i32 : i32, i32
  }
}

</mosaic_0001>

<bundles_post_ra>
// kernel: tpu_custom_call.1
= control target key start
LH: loop header
LB: loop body
LE: loop exit
PB: predicated region body
PF: predicated region fallthrough
CT: control target
= control target key end

     0   :  { %s724_s13 = smov 0   ;;  %s820_s0 = inlined_call_operand.vmem [shape: f32[16,8], index: 0, kind: input, shape index: {}]   ;;  %s821_s1 = inlined_call_operand.vmem [shape: f32[16,8], index: 1, kind: input, shape index: {}]   ;;  %s822_s2 = inlined_call_operand.vmem [shape: f32[16,1], index: 2, kind: input, shape index: {}]   ;;  %s823_s3 = inlined_call_operand.vmem [shape: f32[8,64], index: 3, kind: input, shape index: {}]   ;;  %s824_s4 = inlined_call_operand.vmem [shape: f32[1,64], index: 4, kind: input, shape index: {}]   ;;  %s825_s5 = inlined_call_operand.vmem [shape: f32[64,64], index: 5, kind: input, shape index: {}]   ;;  %s826_s6 = inlined_call_operand.vmem [shape: f32[1,64], index: 6, kind: input, shape index: {}]   ;;  %s827_s7 = inlined_call_operand.vmem [shape: f32[64,16], index: 7, kind: input, shape index: {}]   ;;  %s828_s8 = inlined_call_operand.vmem [shape: f32[1,16], index: 8, kind: input, shape index: {}]   ;;  %s829_s9 = inlined_call_operand.vmem [shape: f32[16,8], index: 9, kind: output, shape index: {0}]   ;;  %s830_s10 = inlined_call_operand.vmem [shape: f32[16,1], index: 10, kind: output, shape index: {1}]  }
   0x1 LB: > { %s629_s14 = sadd.s32 4294967295, %s666_s13   ;;  %p633_p0 = scmp.ge.s32.totalorder %s666_s13, 1  ;;  %s666_s13 = sphi %s724_s13, %s21_s13  }
   0x2   : > { %p332_p1 = scmp.lt.s32.totalorder %s666_s13, 3 }
   0x4   : > { %p333_p2 = pnand %p633_p0, %p332_p1 }
   0x5   : > { %p380_p3 = scmp.lt.s32.totalorder (!%p333_p2), %s629_s14, 1  ;;  %s668_s22 = smov (!%p333_p2), 120  }
   0x6   : > { %336 = sbr.rel (%p333_p2) target bundleno = 555 (0x22b), region = 56 }
   0xb   : > { %v402_v0 = vld [vmem:[%s823_s3] sm:$0xff]  ;;  %v439_v1 = vld [vmem:[%s825_s5 + $0x38] sm:$0xff]  ;;  %v438_v2 = vld [vmem:[%s825_s5 + $0x30] sm:$0xff]  ;;  %s832_s14 = smov (!%p380_p3, %s629_s14), 1  ;;  %vm407_vm0 = vcmask 64512   ;;  %vm444_vm1 = vcmask 523264  }
   0xc   : > { %426 = vmatpush.msra.mxu0 %v402_v0  ;;  %456 = vmatpush.msra.mxu1 %v439_v1  ;;  %v437_v3 = vld [vmem:[%s825_s5 + $0x28] sm:$0xff]  ;;  %s744_s23 = sshll.u32 %s832_s14, 3  ;;  %v436_v4 = vld [vmem:[%s825_s5 + $0x20] sm:$0xff]  ;;  %v435_v6 = vld [vmem:[%s825_s5 + $0x18] sm:$0xff]  ;;  %vm519_vm2 = vcmask 7168  }
   0xd   : > { %s383_s28 = scalar_lea.vmem %s820_s0, %s744_s23  ;;  %v434_v7 = vld [vmem:[%s825_s5 + $0x10] sm:$0xff]  ;;  %v433_v8 = vld [vmem:[%s825_s5 + $0x8] sm:$0xff]  ;;  %v432_v9 = vld [vmem:[%s825_s5] sm:$0xff]  ;;  %s391_s26 = scalar_lea.vmem %s822_s2, %s744_s23 }
   0xe   : > { %457 = vmatpush.msra.mxu1 %v438_v2  ;;  %v400_v5 = vld [vmem:[%s383_s28] sm:$0xff]  ;;  %v476_v10 = vld [vmem:[%s827_s7 + $0x38] sm:$0xff]  ;;  %v475_v11 = vld [vmem:[%s827_s7 + $0x30] sm:$0xff]  ;;  %s399_s29 = scalar_lea.vmem %s830_s10, %s744_s23  ;;  %s387_s12 = scalar_lea.vmem %s821_s1, %s744_s23 }
   0xf   : > { %639 = vmatmul.msk.f32.vlgmr.msra.gmra.mxu0 %vm407_vm0, %v400_v5  ;;  %492 = vmatpush.msra.mxu2 %v476_v10  ;;  %v474_v12 = vld [vmem:[%s827_s7 + $0x28] sm:$0xff]  ;;  %v473_v13 = vld [vmem:[%s827_s7 + $0x20] sm:$0xff]  ;;  %v472_v14 = vld [vmem:[%s827_s7 + $0x18] sm:$0xff]  ;;  %s395_s16 = scalar_lea.vmem %s829_s9, %s744_s23 }
  0x10   : > { %458 = vmatpush.msra.mxu1 %v437_v3  ;;  %v653_v15 = vld [vmem:[%s824_s4] ss:$0 sm:$0xff]  ;;  %v471_v19 = vld [vmem:[%s827_s7 + $0x10] sm:$0xff]  ;;  %v470_v20 = vld [vmem:[%s827_s7 + $0x8] sm:$0xff] }
  0x11   : > { %493 = vmatpush.msra.mxu2 %v475_v11  ;;  %v469_v21 = vld [vmem:[%s827_s7] sm:$0xff] }
  0x12   : > { %459 = vmatpush.msra.mxu1 %v436_v4  ;;  %v654_v22 = vld [vmem:[%s826_s6] ss:$0 sm:$0xff] }
  0x13   : > { %494 = vmatpush.msra.mxu2 %v474_v12  ;;  %v655_v26 = vld [vmem:[%s828_s8] ss:$0 sm:$0xff] }
  0x14   : > { %460 = vmatpush.msra.mxu1 %v435_v6  ;;  %v514_v31 = vld [vmem:[%s391_s26] sm:$0xff] }
  0x15   : > { %495 = vmatpush.msra.mxu2 %v473_v13  ;;  %v401_v36 = vld [vmem:[%s387_s12] sm:$0xff] }
  0x16   : > { %461 = vmatpush.msra.mxu1 %v434_v7 }
  0x17   : > { %496 = vmatpush.msra.mxu2 %v472_v14 }
  0x18   : > { %462 = vmatpush.msra.mxu1 %v433_v8 }
  0x19   : > { %497 = vmatpush.msra.mxu2 %v471_v19 }
  0x1a   : > { %463 = vmatpush.msra.mxu1 %v432_v9 }
  0x1b   : > { %498 = vmatpush.msra.mxu2 %v470_v20 }
  0x1d   : > { %499 = vmatpush.msra.mxu2 %v469_v21 }
  0x8c   : > { %v428_v16 = vpop.f32.mrf.mxu0 }
  0x8d   : > { %v429_v17 = vadd.f32 %v653_v15, %v428_v16 }
  0x8f   : > { %v431_v18 = vmax.f32 %v429_v17, 0.0 }
  0x91   : > { %640 = vmatmul.msk.f32.vlgmr.msra.gmra.mxu1 %vm444_vm1, %v431_v18 }
 0x10e   : > { %v465_v23 = vpop.f32.mrf.mxu1 }
 0x10f   : > { %v466_v24 = vadd.f32 %v654_v22, %v465_v23 }
 0x111   : > { %v468_v25 = vmax.f32 %v466_v24, 0.0 }
 0x113   : > { %641 = vmatmul.msk.f32.vlgmr.msra.gmra.mxu2 %vm444_vm1, %v468_v25 }
 0x196   : > { %v501_v27 = vpop.f32.mrf.mxu2 }
 0x197   : > { %v502_v28 = vadd.f32 %v655_v26, %v501_v27 }
 0x199   : > { %656 = vtanh.f32 %v502_v28 }
 0x19f   : > { %v657_v29 = vpop.eup %656 }
 0x1a0   : > { %v515_v30 = vsel %vm407_vm0, %v657_v29, 0.0  ;;  %v505_v34 = vmul.f32 1.442695, %v657_v29 }
 0x1a1   : > { %516 = vadd.xlane.f32.xlu0 %v515_v30 }
 0x1a2   : > { %658 = vpow2.f32 %v505_v34 }
 0x1a8   : > { %v659_v35 = vpop.eup %658 }
 0x1a9   : > { %v507_v37 = vmul.f32 %v659_v35, %v401_v36 }
 0x1b5   : > { %509 = vrot.lane.b32.xlu0 %v657_v29, %s668_s22 }
 0x214   : > { %v517_v32 = vpop.xlane.xlu0 %516 }
 0x215   : > { %v518_v33 = vadd.f32 %v517_v32, %v514_v31 }
 0x217   : > { %520 = vst.msk [vmem:[%s399_s29] sm:$0xff] %vm519_vm2, %v518_v33 }
 0x227   : > { %v510_v38 = vpop.permute.xlu0 %509 }
 0x228   : > { %v512_v39 = vadd.f32 %v510_v38, %v507_v37 }
 0x22a   : > { %513 = vst.msk [vmem:[%s395_s16] sm:$0xff] %vm407_vm0, %v512_v39 }
 0x22b PF: > { %s21_s13 = sadd.s32 1, %s666_s13  }
 0x22c   : > { %p18_p4 = scmp.ge.s32.totalorder %s21_s13, 4  }
 0x22e   :  { %20 = sbr.rel (!%p18_p4) target bundleno = 1 (0x1), region = 104 }

</bundles_post_ra>
